<compile_context>
chip_gen: v5e
topology: v5e:2x2
jax: 0.10.0
libtpu: 0.0.40
codegen_flags: <defaults>
</compile_context>

<pallas_src>
import jax
import jax.numpy as jnp
from jax.experimental import pallas as pl
from jax.experimental.pallas import tpu as pltpu


def _pick_block(n, target):
    """Largest block <= target that divides n and satisfies the TPU
    second-minor tiling rule (multiple of 8, or the full dimension)."""
    if n <= target:
        return n
    for d in range(min(target, n), 7, -1):
        if n % d == 0 and d % 8 == 0:
            return d
    return n  # no aligned divisor below target -> don't tile this axis


def _feedback_head_kernel(nchunks_ref, lens_ref, lhs_ref, cls_ref, q_ref,
                          w_ref, b_ref, out_ref, acc_ref):
    # Grid: (batch blocks, sequence chunks); sequence is the reduction axis.
    #   nchunks_ref : SMEM (num_b,)   useful S-chunks per batch block (prefetch)
    #   lens_ref    : (Bt, 1)    per-row valid token counts (f32)
    #   lhs_ref     : (Bt, St, H) last_hidden_state chunk (native dtype stream)
    #   cls_ref     : (Bt, L, H)  CLS token of each selected layer
    #   q_ref       : (1, H)      attention-pooling query (f32)
    #   w_ref       : (2H, NC)    [fc_w[:H] ; w_h @ fc_w[H:]] folded classifier
    #   b_ref       : (1, NC)     classifier bias (f32)
    #   out_ref     : (Bt, NC)    logits (f32)
    #   acc_ref     : (Bt, 1, H)  f32 scratch accumulator for the masked sum
    b = pl.program_id(0)
    s = pl.program_id(1)
    ns = pl.num_programs(1)
    Bt, St, H = lhs_ref.shape

    @pl.when(s == 0)
    def _init():
        acc_ref[...] = jnp.zeros_like(acc_ref)

    # ---- MeanPooling numerator: chunked masked sum over the sequence --------
    # Chunks that are pure padding for this whole batch block are skipped; the
    # clamped index_map means they are not even re-fetched from HBM.
    @pl.when(s < nchunks_ref[b])
    def _accumulate():
        x = lhs_ref[...]                                          # (Bt, St, H)
        pos = s * St + jax.lax.broadcasted_iota(jnp.int32, (Bt, St), 1)
        valid = pos.astype(jnp.float32) < lens_ref[...]           # (Bt, St)
        m = valid.astype(x.dtype).reshape(Bt, 1, St)              # exact 0/1
        # MXU contraction (mask-row @ chunk): keeps the VPU out of the hot
        # loop and accumulates in f32 without an f32 copy of the chunk.
        acc_ref[...] += jnp.einsum('bms,bsh->bmh', m, x,
                                   preferred_element_type=jnp.float32)

    # ---- Finalize once per batch block: attention pool + classifier ---------
    @pl.when(s == ns - 1)
    def _finalize():
        denom = jnp.maximum(lens_ref[...], 1e-9)                  # (Bt, 1)
        mean = acc_ref[...][:, 0, :] / denom                      # (Bt, H)

        h = cls_ref[...].astype(jnp.float32)                      # (Bt, L, H)
        q = q_ref[...].reshape(1, 1, H)                           # (1, 1, H)
        scores = jnp.sum(h * q, axis=2, keepdims=True)            # (Bt, L, 1)
        scores = scores - jnp.max(scores, axis=1, keepdims=True)
        p = jnp.exp(scores)
        w = p / jnp.sum(p, axis=1, keepdims=True)                 # softmax f32
        v_temp = jnp.sum(w * h, axis=1)                           # (Bt, H)

        # concat + single fused classifier matmul (w_h already folded into W).
        feat = jnp.concatenate([mean, v_temp], axis=-1)           # (Bt, 2H)
        out_ref[...] = (jnp.dot(feat, w_ref[...],
                                preferred_element_type=jnp.float32)
                        + b_ref[...])


def feedback_head(last_hidden, mask, cls_tokens, q, w_h, fc_w, fc_b,
                  *, block_b=16, block_s=256,
                  vmem_limit_bytes=48 * 1024 * 1024):
    """FeedbackModel head: last_hidden (B,S,H), mask (B,S), cls_tokens (B,L,H)
    -> logits (B,NC).

    Tiling guidance:
      v7x (64 MiB VMEM/TC): block_b 16-32, block_s 128-256, vmem limit ~48 MiB.
      v5e/v6e (128 MiB):    block_b 16-32, block_s 256-512; the vmem limit may
                            be raised to 64-96 MiB for bigger DMAs.
    Block sizes are snapped to divisors of B / S (multiple of 8 or the full
    dim), so no host-side padding copies are made.  Activations are streamed
    in whatever dtype the backbone emits (no standalone cast pass); all
    reductions / softmax / matmul accumulation happen in f32 in-kernel.
    """
    B, S, H = last_hidden.shape
    L = cls_tokens.shape[1]
    NC = fc_w.shape[1]

    Bt = _pick_block(B, block_b)
    St = _pick_block(S, block_s)
    num_b = B // Bt
    num_s = S // St

    # Per-row valid token counts (prefix-mask assumption; see header NOTE).
    lens_i = jnp.sum(mask.astype(jnp.int32), axis=1)              # (B,)
    lens_f = lens_i.astype(jnp.float32).reshape(B, 1)             # (B, 1)
    blk_max = jnp.max(lens_i.reshape(num_b, Bt), axis=1)          # (num_b,)
    nchunks = jnp.maximum((blk_max + St - 1) // St, 1).astype(jnp.int32)

    # Fold w_h into the classifier and stack into one (2H, NC) weight:
    #   logits = [mean, v_temp] @ [fc_w[:H] ; w_h @ fc_w[H:]] + b
    W = jnp.concatenate(
        [fc_w[:H, :].astype(jnp.float32),
         jnp.matmul(w_h, fc_w[H:, :],
                    precision=jax.lax.Precision.HIGHEST).astype(jnp.float32)],
        axis=0)                                                   # (2H, NC)
    b2 = fc_b.reshape(1, NC).astype(jnp.float32)
    q2 = q.astype(jnp.float32)

    return pl.pallas_call(
        _feedback_head_kernel,
        out_shape=jax.ShapeDtypeStruct((B, NC), jnp.float32),
        grid_spec=pltpu.PrefetchScalarGridSpec(
            num_scalar_prefetch=1,
            grid=(num_b, num_s),
            in_specs=[
                pl.BlockSpec((Bt, 1), lambda b, s, nch: (b, 0)),       # lens
                pl.BlockSpec(                                          # hidden
                    (Bt, St, H),
                    lambda b, s, nch: (b, jnp.minimum(s, nch[b] - 1), 0)),
                pl.BlockSpec((Bt, L, H), lambda b, s, nch: (b, 0, 0)),  # CLS
                pl.BlockSpec((1, H), lambda b, s, nch: (0, 0)),         # q
                pl.BlockSpec((2 * H, NC), lambda b, s, nch: (0, 0)),    # W
                pl.BlockSpec((1, NC), lambda b, s, nch: (0, 0)),        # bias
            ],
            out_specs=pl.BlockSpec((Bt, NC), lambda b, s, nch: (b, 0)),
            scratch_shapes=[pltpu.VMEM((Bt, 1, H), jnp.float32)],
        ),
        compiler_params=pltpu.CompilerParams(
            dimension_semantics=("parallel", "arbitrary"),
            vmem_limit_bytes=vmem_limit_bytes,
        ),
    )(nchunks, lens_f, last_hidden, cls_tokens, q2, W, b2)


def reference_forward(hidden_states, mask, q, w_h, fc_w, fc_b, num_layers):
    """Pure-JAX replica of FeedbackModel.forward (post-transformer, unfused)."""
    total = hidden_states.shape[0]
    last = hidden_states[-1]                                  # (B,S,H)
    m = mask.astype(jnp.float32)[..., None]                   # (B,S,1)
    sum_emb = jnp.sum(last * m, axis=1)
    sum_mask = jnp.clip(jnp.sum(m, axis=1), 1e-9, None)
    out_hor = sum_emb / sum_mask                              # (B,H)

    cls = hidden_states[total - num_layers:total, :, 0, :]    # (L,B,H)
    h = jnp.transpose(cls, (1, 0, 2))                         # (B,L,H)
    v = jnp.einsum('oh,blh->bl', q, h)
    v = jax.nn.softmax(v, axis=-1)
    v_temp = jnp.einsum('bl,blh->bh', v, h)
    out_ver = v_temp @ w_h                                    # (B,H)

    feat = jnp.concatenate([out_hor, out_ver], axis=-1)       # (B,2H)
    return feat @ fc_w + fc_b                                 # (B,NC)


if __name__ == "__main__":
    B, S, H = 2, 8, 32
    TOTAL_LAYERS, NUM_LAYERS = 25, 24
    NC = 3

    key = jax.random.PRNGKey(0)
    k_hs, k_q, k_wh, k_fw, k_fb = jax.random.split(key, 5)

    # Synthetic transformer outputs.  The backbone is assumed to emit bf16
    # activations; the kernel streams them as-is (no extra host cast pass).
    hidden_states = jax.random.normal(
        k_hs, (TOTAL_LAYERS, B, S, H), dtype=jnp.float32).astype(jnp.bfloat16)

    # Attention mask: first example fully valid, second has trailing padding.
    seq_ids = jnp.arange(S)[None, :]
    valid_len = jnp.array([[S], [S - 3]])
    mask = (seq_ids < valid_len).astype(jnp.int32)            # (B, S)

    # Deterministic parameter init (matches module __init__ shapes).
    q = 0.1 * jax.random.normal(k_q, (1, H), dtype=jnp.float32)
    w_h = 0.1 * jax.random.normal(k_wh, (H, H), dtype=jnp.float32)
    fc_w = 0.1 * jax.random.normal(k_fw, (2 * H, NC), dtype=jnp.float32)
    fc_b = 0.1 * jax.random.normal(k_fb, (NC,), dtype=jnp.float32)

    # Glue: last_hidden_state and per-layer CLS tokens for the kernel.
    last_hidden = hidden_states[-1]                                       # (B,S,H)
    cls_tokens = jnp.transpose(
        hidden_states[TOTAL_LAYERS - NUM_LAYERS:TOTAL_LAYERS, :, 0, :],
        (1, 0, 2))                                                        # (B,L,H)

    logits = feedback_head(last_hidden, mask, cls_tokens, q, w_h, fc_w, fc_b)
    logits = jax.block_until_ready(logits)

    # Reference consumes the same bf16 activations (upcast to f32 for math);
    # weights are f32 everywhere, so the comparison isolates only the f32
    # accumulation order and the w_h -> W2 folding reassociation.
    ref = reference_forward(hidden_states.astype(jnp.float32), mask,
                            q, w_h, fc_w, fc_b, NUM_LAYERS)
    ref = jax.block_until_ready(ref)

    assert logits.shape == (B, NC)
    assert jnp.allclose(logits, ref, atol=1e-4, rtol=1e-4), (logits, ref)
    print("KERNEL_OK")
</pallas_src>

<mosaic_0001>
module attributes {stable_mosaic.version = 11 : i64} {
  func.func @_feedback_head_kernel(%arg0: i32, %arg1: i32, %arg2: memref<1xi32, #tpu.memory_space<smem>>, %arg3: memref<2x1xf32, #tpu.memory_space<vmem>>, %arg4: memref<2x8x32xbf16, #tpu.memory_space<vmem>>, %arg5: memref<2x24x32xbf16, #tpu.memory_space<vmem>>, %arg6: memref<1x32xf32, #tpu.memory_space<vmem>>, %arg7: memref<64x3xf32, #tpu.memory_space<vmem>>, %arg8: memref<1x3xf32, #tpu.memory_space<vmem>>, %arg9: memref<2x3xf32, #tpu.memory_space<vmem>>, %arg10: memref<2x1x32xf32, #tpu.memory_space<vmem>>) attributes {dimension_semantics = [#tpu.dimension_semantics<parallel>, #tpu.dimension_semantics<arbitrary>], iteration_bounds = array<i64: 1, 1>, scalar_prefetch = 1 : i64, scratch_operands = 1 : i64, tpu.core_type = #tpu.core_type<tc>, window_params = [{transform_indices = @transform_0, window_bounds = array<i64: 2, 1>}, {transform_indices = @transform_1, window_bounds = array<i64: 2, 8, 32>}, {transform_indices = @transform_2, window_bounds = array<i64: 2, 24, 32>}, {pipeline_mode = #tpu.pipeline_mode<synchronous>, transform_indices = @transform_3, window_bounds = array<i64: 1, 32>}, {pipeline_mode = #tpu.pipeline_mode<synchronous>, transform_indices = @transform_4, window_bounds = array<i64: 64, 3>}, {pipeline_mode = #tpu.pipeline_mode<synchronous>, transform_indices = @transform_5, window_bounds = array<i64: 1, 3>}, {transform_indices = @transform_6, window_bounds = array<i64: 2, 3>}]} {
    %c0_i32 = arith.constant 0 : i32
    %0 = arith.cmpi eq, %arg1, %c0_i32 : i32
    %1 = arith.extui %0 : i1 to i32
    %c0_i32_0 = arith.constant 0 : i32
    %2 = arith.cmpi ne, %1, %c0_i32_0 : i32
    scf.if %2 {
      %cst = arith.constant 0.000000e+00 : f32
      %11 = vector.broadcast %cst : f32 to vector<2x1x32xf32>
      %c0 = arith.constant 0 : index
      %c0_4 = arith.constant 0 : index
      %c0_5 = arith.constant 0 : index
      %12 = vector.load %arg10[%c0, %c0_4, %c0_5] : memref<2x1x32xf32, #tpu.memory_space<vmem>>, vector<2x1x32xf32>
      tpu.vector_store %arg10[%c0, %c0_4, %c0_5], %11 {strides = array<i32>} : memref<2x1x32xf32, #tpu.memory_space<vmem>>, vector<2x1x32xf32>,
    } else {
    }
    %3 = arith.index_cast %arg0 : i32 to index
    %4 = memref.load %arg2[%3] : memref<1xi32, #tpu.memory_space<smem>>
    %5 = arith.cmpi slt, %arg1, %4 : i32
    %6 = arith.extui %5 : i1 to i32
    %c0_i32_1 = arith.constant 0 : i32
    %7 = arith.cmpi ne, %6, %c0_i32_1 : i32
    scf.if %7 {
      %c0 = arith.constant 0 : index
      %c0_4 = arith.constant 0 : index
      %c0_5 = arith.constant 0 : index
      %11 = vector.load %arg4[%c0, %c0_4, %c0_5] : memref<2x8x32xbf16, #tpu.memory_space<vmem>>, vector<2x8x32xbf16>
      %c8_i32 = arith.constant 8 : i32
      %12 = arith.muli %arg1, %c8_i32 : i32
      %13 = tpu.iota {dimensions = array<i32: 1>} : vector<2x8xi32>
      %14 = vector.broadcast %12 : i32 to vector<2x8xi32>
      %15 = arith.addi %14, %13 : vector<2x8xi32>
      %16 = arith.sitofp %15 : vector<2x8xi32> to vector<2x8xf32>
      %c0_6 = arith.constant 0 : index
      %c0_7 = arith.constant 0 : index
      %17 = vector.load %arg3[%c0_6, %c0_7] : memref<2x1xf32, #tpu.memory_space<vmem>>, vector<2x1xf32>
      %18 = vector.broadcast %17 : vector<2x1xf32> to vector<2x8xf32>
      %19 = arith.cmpf olt, %16, %18 : vector<2x8xf32>
      %20 = arith.extui %19 : vector<2x8xi1> to vector<2x8xi32>
      %21 = arith.sitofp %20 : vector<2x8xi32> to vector<2x8xf32>
      %22 = arith.truncf %21 : vector<2x8xf32> to vector<2x8xbf16>
      %23 = vector.shape_cast %22 : vector<2x8xbf16> to vector<2x1x8xbf16>
      %c0_8 = arith.constant 0 : index
      %c0_9 = arith.constant 0 : index
      %c0_10 = arith.constant 0 : index
      %24 = vector.load %arg10[%c0_8, %c0_9, %c0_10] : memref<2x1x32xf32, #tpu.memory_space<vmem>>, vector<2x1x32xf32>
      "tpu.trace_start"() <{level = 10 : i32, message = "bms,bsh->bmh"}> : () -> ()
      %cst = arith.constant dense<0.000000e+00> : vector<2x1x32xf32>
      %25 = tpu.matmul %23, %11, %cst {dimension_numbers = #tpu.dot_dimension_numbers<[2], [1], [1], [2], [0, 0, 0, 1, 1, 2], [0], [0]>} : vector<2x1x8xbf16>, vector<2x8x32xbf16>, vector<2x1x32xf32> -> vector<2x1x32xf32>
      "tpu.trace_stop"() : () -> ()
      %26 = arith.addf %24, %25 : vector<2x1x32xf32>
      %c0_11 = arith.constant 0 : index
      %c0_12 = arith.constant 0 : index
      %c0_13 = arith.constant 0 : index
      %27 = vector.load %arg10[%c0_11, %c0_12, %c0_13] : memref<2x1x32xf32, #tpu.memory_space<vmem>>, vector<2x1x32xf32>
      tpu.vector_store %arg10[%c0_11, %c0_12, %c0_13], %26 {strides = array<i32>} : memref<2x1x32xf32, #tpu.memory_space<vmem>>, vector<2x1x32xf32>,
    } else {
    }
    %c0_i32_2 = arith.constant 0 : i32
    %8 = arith.cmpi eq, %arg1, %c0_i32_2 : i32
    %9 = arith.extui %8 : i1 to i32
    %c0_i32_3 = arith.constant 0 : i32
    %10 = arith.cmpi ne, %9, %c0_i32_3 : i32
    scf.if %10 {
      %c0 = arith.constant 0 : index
      %c0_4 = arith.constant 0 : index
      %11 = vector.load %arg3[%c0, %c0_4] : memref<2x1xf32, #tpu.memory_space<vmem>>, vector<2x1xf32>
      %cst = arith.constant 9.99999971E-10 : f32
      %12 = vector.broadcast %cst : f32 to vector<2x1xf32>
      %13 = arith.maximumf %11, %12 : vector<2x1xf32>
      %c0_5 = arith.constant 0 : index
      %c0_6 = arith.constant 0 : index
      %c0_7 = arith.constant 0 : index
      %14 = vector.load %arg10[%c0_5, %c0_6, %c0_7] : memref<2x1x32xf32, #tpu.memory_space<vmem>>, vector<2x1x32xf32>
      %15 = vector.shape_cast %14 : vector<2x1x32xf32> to vector<2x32xf32>
      %16 = vector.broadcast %13 : vector<2x1xf32> to vector<2x32xf32>
      %17 = arith.divf %15, %16 : vector<2x32xf32>
      %c0_8 = arith.constant 0 : index
      %c0_9 = arith.constant 0 : index
      %c0_10 = arith.constant 0 : index
      %18 = vector.load %arg5[%c0_8, %c0_9, %c0_10] : memref<2x24x32xbf16, #tpu.memory_space<vmem>>, vector<2x24x32xbf16>
      %19 = arith.extf %18 : vector<2x24x32xbf16> to vector<2x24x32xf32>
      %c0_11 = arith.constant 0 : index
      %c0_12 = arith.constant 0 : index
      %20 = vector.load %arg6[%c0_11, %c0_12] : memref<1x32xf32, #tpu.memory_space<vmem>>, vector<1x32xf32>
      %21 = vector.shape_cast %20 : vector<1x32xf32> to vector<1x1x32xf32>
      %22 = vector.broadcast %21 : vector<1x1x32xf32> to vector<2x24x32xf32>
      %23 = arith.mulf %19, %22 : vector<2x24x32xf32>
      %cst_13 = arith.constant dense<0.000000e+00> : vector<2x24xf32>
      %24 = vector.multi_reduction <add>, %23, %cst_13 [2] : vector<2x24x32xf32> to vector<2x24xf32>
      %25 = vector.shape_cast %24 : vector<2x24xf32> to vector<2x24x1xf32>
      %cst_14 = arith.constant dense<0xFF800000> : vector<2x1xf32>
      %26 = vector.multi_reduction <maximumf>, %25, %cst_14 [1] : vector<2x24x1xf32> to vector<2x1xf32>
      %27 = vector.shape_cast %26 : vector<2x1xf32> to vector<2x1x1xf32>
      %28 = vector.broadcast %27 : vector<2x1x1xf32> to vector<2x24x1xf32>
      %29 = arith.subf %25, %28 : vector<2x24x1xf32>
      %30 = math.exp %29 : vector<2x24x1xf32>
      %cst_15 = arith.constant dense<0.000000e+00> : vector<2x1xf32>
      %31 = vector.multi_reduction <add>, %30, %cst_15 [1] : vector<2x24x1xf32> to vector<2x1xf32>
      %32 = vector.shape_cast %31 : vector<2x1xf32> to vector<2x1x1xf32>
      %33 = vector.broadcast %32 : vector<2x1x1xf32> to vector<2x24x1xf32>
      %34 = arith.divf %30, %33 : vector<2x24x1xf32>
      %35 = vector.broadcast %34 : vector<2x24x1xf32> to vector<2x24x32xf32>
      %36 = arith.mulf %35, %19 : vector<2x24x32xf32>
      %cst_16 = arith.constant dense<0.000000e+00> : vector<2x32xf32>
      %37 = vector.multi_reduction <add>, %36, %cst_16 [1] : vector<2x24x32xf32> to vector<2x32xf32>
      %38 = tpu.concatenate %17, %37 in 1 : vector<2x32xf32>, vector<2x32xf32> -> vector<2x64xf32>
      %c0_17 = arith.constant 0 : index
      %c0_18 = arith.constant 0 : index
      %39 = vector.load %arg7[%c0_17, %c0_18] : memref<64x3xf32, #tpu.memory_space<vmem>>, vector<64x3xf32>
      %cst_19 = arith.constant dense<0.000000e+00> : vector<2x3xf32>
      %40 = tpu.matmul %38, %39, %cst_19 {dimension_numbers = #tpu.dot_dimension_numbers<[1], [0], [0], [1], [0, 0, 1, 1], [], []>} : vector<2x64xf32>, vector<64x3xf32>, vector<2x3xf32> -> vector<2x3xf32>
      %c0_20 = arith.constant 0 : index
      %c0_21 = arith.constant 0 : index
      %41 = vector.load %arg8[%c0_20, %c0_21] : memref<1x3xf32, #tpu.memory_space<vmem>>, vector<1x3xf32>
      %42 = vector.broadcast %41 : vector<1x3xf32> to vector<2x3xf32>
      %43 = arith.addf %40, %42 : vector<2x3xf32>
      %c0_22 = arith.constant 0 : index
      %c0_23 = arith.constant 0 : index
      %44 = vector.load %arg9[%c0_22, %c0_23] : memref<2x3xf32, #tpu.memory_space<vmem>>, vector<2x3xf32>
      tpu.vector_store %arg9[%c0_22, %c0_23], %43 {strides = array<i32>} : memref<2x3xf32, #tpu.memory_space<vmem>>, vector<2x3xf32>,
    } else {
    }
    return
  }
  func.func @transform_0(%arg0: i32, %arg1: i32, %arg2: memref<1xi32, #tpu.memory_space<smem>>) -> (i32, i32) {
    %c0_i32 = arith.constant 0 : i32
    %c0_i32_0 = arith.constant 0 : i32
    return %arg0, %c0_i32 : i32, i32
  }
  func.func @transform_1(%arg0: i32, %arg1: i32, %arg2: memref<1xi32, #tpu.memory_space<smem>>) -> (i32, i32, i32) {
    %0 = arith.index_cast %arg0 : i32 to index
    %1 = memref.load %arg2[%0] : memref<1xi32, #tpu.memory_space<smem>>
    %c1_i32 = arith.constant 1 : i32
    %2 = arith.subi %1, %c1_i32 : i32
    %3 = arith.minsi %arg1, %2 : i32
    %c0_i32 = arith.constant 0 : i32
    %c0_i32_0 = arith.constant 0 : i32
    return %arg0, %3, %c0_i32 : i32, i32, i32
  }
  func.func @transform_2(%arg0: i32, %arg1: i32, %arg2: memref<1xi32, #tpu.memory_space<smem>>) -> (i32, i32, i32) {
    %c0_i32 = arith.constant 0 : i32
    %c0_i32_0 = arith.constant 0 : i32
    %c0_i32_1 = arith.constant 0 : i32
    return %arg0, %c0_i32, %c0_i32_0 : i32, i32, i32
  }
  func.func @transform_3(%arg0: i32, %arg1: i32, %arg2: memref<1xi32, #tpu.memory_space<smem>>) -> (i32, i32) {
    %c0_i32 = arith.constant 0 : i32
    %c0_i32_0 = arith.constant 0 : i32
    %c0_i32_1 = arith.constant 0 : i32
    return %c0_i32, %c0_i32_0 : i32, i32
  }
  func.func @transform_4(%arg0: i32, %arg1: i32, %arg2: memref<1xi32, #tpu.memory_space<smem>>) -> (i32, i32) {
    %c0_i32 = arith.constant 0 : i32
    %c0_i32_0 = arith.constant 0 : i32
    %c0_i32_1 = arith.constant 0 : i32
    return %c0_i32, %c0_i32_0 : i32, i32
  }
  func.func @transform_5(%arg0: i32, %arg1: i32, %arg2: memref<1xi32, #tpu.memory_space<smem>>) -> (i32, i32) {
    %c0_i32 = arith.constant 0 : i32
    %c0_i32_0 = arith.constant 0 : i32
    %c0_i32_1 = arith.constant 0 : i32
    return %c0_i32, %c0_i32_0 : i32, i32
  }
  func.func @transform_6(%arg0: i32, %arg1: i32, %arg2: memref<1xi32, #tpu.memory_space<smem>>) -> (i32, i32) {
    %c0_i32 = arith.constant 0 : i32
    %c0_i32_0 = arith.constant 0 : i32
    return %arg0, %c0_i32 : i32, i32
  }
}

</mosaic_0001>

<bundles_post_ra>
// kernel: tpu_custom_call.1
= control target key start
LH: loop header
LB: loop body
LE: loop exit
PB: predicated region body
PF: predicated region fallthrough
CT: control target
= control target key end

     0   :  { %13 = vsyncpa [#allocation6], 0  ;;  %vm63_vm0 = vcmask 253952   ;;  %v505_v0 = vmov 0.0   ;;  %s661_s0 = inlined_call_operand.<no memory space> [shape: s32[1], index: 0, kind: input, shape index: {}]   ;;  %s662_s1 = inlined_call_operand.vmem [shape: f32[2,1], index: 1, kind: input, shape index: {}]   ;;  %s663_s2 = inlined_call_operand.vmem [shape: bf16[2,8,32], index: 2, kind: input, shape index: {}]   ;;  %s664_s3 = inlined_call_operand.vmem [shape: bf16[2,24,32], index: 3, kind: input, shape index: {}]   ;;  %s665_s4 = inlined_call_operand.vmem [shape: f32[1,32], index: 4, kind: input, shape index: {}]   ;;  %s666_s5 = inlined_call_operand.vmem [shape: f32[64,3], index: 5, kind: input, shape index: {}]   ;;  %s667_s6 = inlined_call_operand.vmem [shape: f32[1,3], index: 6, kind: input, shape index: {}]   ;;  %s668_s7 = inlined_call_operand.hbm [shape: f32[2,3], index: 7, kind: output, shape index: {}]  }
   0x1   :  { %s422_s26 = sadd.s32 4294967295, %s661_s0  ;;  %64 = vst.msk [vmem:[#allocation2] sm:$0x1] %vm63_vm0, %v505_v0  ;;  %p429_p2 = scmp.le.s32.totalorder %s661_s0, 0 }
   0x2   :  { %p423_p0 = scmp.gt.s32.totalorder %s422_s26, 0  ;;  %p425_p1 = scmp.lt.s32.totalorder %s422_s26, 0  ;;  %65 = vst.msk [vmem:[#allocation2 + $0x1] sm:$0x1] %vm63_vm0, %v505_v0 }
   0x3   :  { %70 = sbr.rel (%p429_p2) target bundleno = 272 (0x110), region = 33 }
   0x4   :  { %s670_s26 = smov (%p423_p0, %s422_s26), 0 }
   0x5   :  { %s672_s26 = smov (!%p425_p1, %s670_s26), 0 }
   0x6   :  { %s427_s27 = sshll.u32 %s672_s26, 2 }
   0x7   :  { %s53_s30 = scalar_lea.vmem %s663_s2, %s427_s27 }
   0x8   :  { %v79_v1 = vld [vmem:[%s662_s1] sm:$0x3]  ;;  %v506_v2 = vmov 0   ;;  %vm106_vm1 = vcmask 1043456   ;;  %v72_v4 = vld [vmem:[%s53_s30 + $0x4] sm:$0xf]  ;;  %v74_v7 = vlaneseq }
   0x9   :  { %455 = vset.pattern.permute.xlu0 %v506_v2  ;;  %v71_v3 = vld [vmem:[%s53_s30] sm:$0xf]  ;;  %v129_v6 = vsel %vm106_vm1, %v72_v4, 0  ;;  %v507_v11 = vmov 0.0   ;;  %vm91_vm3 = vcmask 1040384   ;;  %vm102_vm4 = vcmask 64512  }
   0xa   :  { %82 = vperm.xlu0 %455, %v79_v1   ;;  %v108_v5 = vsel %vm106_vm1, %v71_v3, 0  ;;  %138 = vmatpush.bf16.msra.mxu1 %v129_v6  ;;  %v75_v8 = vand.u32 127, %v74_v7  ;;  %v98_v21 = vld [vmem:[#allocation2] sm:$0x1]  ;;  %v99_v23 = vld [vmem:[#allocation2 + $0x1] sm:$0x1] }
   0xb   :  { %117 = vmatpush.bf16.msra.mxu0 %v108_v5 }
   0xc   :  { %v78_v9 = vcvt.s32.f32 %v75_v8 }
  0x7c   :  { %v83_v10 = vpop.permute.xlu0 %82 }
  0x7d   :  { %vm85_vm2 = vcmp.lt.f32.partialorder %v78_v9, %v83_v10 }
  0x7e   :  { %v430_v12 = vsel %vm85_vm2, 1.0, %v507_v11 }
  0x7f   :  { %v88_v13 = vpack.c.bf16 %v430_v12, %v430_v12 }
  0x81   :  { %v90_v14 = vrot.slane %v88_v13, 3 }
  0x83   :  { %v94_v15 = vsel %vm91_vm3, %v88_v13, %v90_v14 }
  0x84   :  { %v431_v16 = vpack.i.b16 %v94_v15, %v94_v15  ;;  %v97_v17 = vunpack.i.h.s16 %v94_v15 }
  0x86   :  { %v101_v18 = vperm.slane %v431_v16, 0  ;;  %v123_v19 = vpack.i.b16 %v97_v17, %v97_v17 }
  0x88   :  { %432 = vmatmul.msk.bf16.vlgmr.msra.gmra.mxu0 %vm102_vm4, %v101_v18  ;;  %v124_v20 = vperm.slane %v123_v19, 0 }
  0x8a   :  { %433 = vmatmul.msk.bf16.vlgmr.msra.gmra.mxu1 %vm102_vm4, %v124_v20 }
 0x105   :  { %v119_v22 = vpop.f32.mrf.mxu0 }
 0x106   :  { %v144_v24 = vadd.f32 %v119_v22, %v98_v21 }
 0x107   :  { %v140_v25 = vpop.f32.mrf.mxu1 }
 0x108   :  { %147 = vst.msk [vmem:[#allocation2] sm:$0x1] %vm63_vm0, %v144_v24  ;;  %v145_v26 = vadd.f32 %v140_v25, %v99_v23 }
 0x10a   :  { %148 = vst.msk [vmem:[#allocation2 + $0x1] sm:$0x1] %vm63_vm0, %v145_v26 }
 0x10d   :  { %v121_v27 = vpop.f32.mrf.mxu0 }
 0x10f   :  { %v142_v28 = vpop.f32.mrf.mxu1 }
 0x110 PF:  { %v570_v29 = vld [vmem:[%s664_s3 + $0x8] sm:$0xff]   ;;  %v457_v30 = vld [vmem:[%s665_s4] ss:$0 sm:$0xff]  ;;  %v584_v33 = vld [vmem:[%s664_s3 + $0x10] sm:$0xff]   ;;  %vm216_vm5 = vcmask 261120   ;;  %v508_v8 = vmov 0  }
 0x111   :  { %v442_v31 = vunpack.c.h.bf16 %v570_v29  ;;  %v579_v32 = vld [vmem:[%s664_s3] sm:$0xff]   ;;  %v446_v37 = vunpack.c.h.bf16 %v584_v33  ;;  %v441_v40 = vunpack.c.l.bf16 %v570_v29  ;;  %v445_v41 = vunpack.c.l.bf16 %v584_v33  ;;  %456 = vset.pattern.permute.xlu0 %v508_v8  ;;  %s510_s2 = smov [#allocation5]   ;;  %s407_s15 = sshll.u32 %s668_s7, 4  ;;  %s408_s15 = int_to_ptr.hbm [resolvable:$true] %s407_s15 }
 0x112   :  { %v437_v34 = vunpack.c.l.bf16 %v579_v32  ;;  %v438_v35 = vunpack.c.h.bf16 %v579_v32  ;;  %v152_v4 = vld [vmem:[%s662_s1] sm:$0x3]  ;;  %vm356_vm14 = vcmask 1041409   ;;  %s509_s1 = smov 32   ;;  %s405_s12 = sshll.u32 %s510_s2, 4  ;;  %s406_s12 = int_to_ptr.vmem [resolvable:$true] %s405_s12 }
 0x113   :  { %v213_v36 = vmul.f32 %v457_v30, %v442_v31  ;;  %v215_v45 = vmul.f32 %v457_v30, %v446_v37  ;;  %v212_v46 = vmul.f32 %v457_v30, %v441_v40  ;;  %v214_v47 = vmul.f32 %v457_v30, %v445_v41 }
 0x114   :  { %v210_v38 = vmul.f32 %v457_v30, %v437_v34  ;;  %v211_v39 = vmul.f32 %v457_v30, %v438_v35  ;;  %v153_v6 = vmax.f32 %v152_v4, 1e-09 }
 0x115   :  { %v226_v42 = vsel %vm216_vm5, %v213_v36, 0.0  ;;  %v232_v48 = vsel %vm216_vm5, %v215_v45, 0.0  ;;  %v223_v49 = vsel %vm216_vm5, %v212_v46, 0.0  ;;  %v229_v50 = vsel %vm216_vm5, %v214_v47, 0.0 }
 0x116   :  { %227 = vadd.xlane.f32.xlu1 %v226_v42  ;;  %v217_v43 = vsel %vm216_vm5, %v210_v38, 0.0  ;;  %v220_v44 = vsel %vm216_vm5, %v211_v39, 0.0 }
 0x117   :  { %218 = vadd.xlane.f32.xlu0 %v217_v43  ;;  %221 = vadd.xlane.f32.xlu2 %v220_v44 }
 0x11e   :  { %233 = vadd.xlane.f32.xlu1 %v232_v48 }
 0x11f   :  { %224 = vadd.xlane.f32.xlu0 %v223_v49  ;;  %230 = vadd.xlane.f32.xlu2 %v229_v50 }
 0x133   :  { %158 = vperm.xlu0 %456, %v153_v6  }
 0x189   :  { %v228_v51 = vpop.xlane.xlu1 %227 }
 0x18a   :  { %v219_v52 = vpop.xlane.xlu0 %218  ;;  %v222_v53 = vpop.xlane.xlu2 %221 }
 0x191   :  { %v234_v54 = vpop.xlane.xlu1 %233 }
 0x192   :  { %v243_v55 = vmax.f32 %v228_v51, %v234_v54  ;;  %v225_v56 = vpop.xlane.xlu0 %224  ;;  %v231_v57 = vpop.xlane.xlu2 %230 }
 0x193   :  { %v235_v58 = vmax.f32 %v219_v52, %v225_v56 }
 0x194   :  { %v244_v59 = vmax.f32 %v243_v55, %v231_v57 }
 0x195   :  { %v236_v60 = vmax.f32 %v235_v58, %v222_v53 }
 0x196   :  { %v245_v61 = vrot.slane %v244_v59, 4 }
 0x197   :  { %v237_v62 = vrot.slane %v236_v60, 4 }
 0x198   :  { %v246_v63 = vmax.f32 %v244_v59, %v245_v61 }
 0x199   :  { %v238_v0 = vmax.f32 %v236_v60, %v237_v62 }
 0x19a   :  { %v247_v1 = vrot.slane %v246_v63, 2 }
 0x19b   :  { %v239_v2 = vrot.slane %v238_v0, 2 }
 0x19c   :  { %v248_v3 = vmax.f32 %v246_v63, %v247_v1 }
 0x19d   :  { %v240_v5 = vmax.f32 %v238_v0, %v239_v2 }
 0x19e   :  { %v249_v7 = vrot.slane %v248_v3, 1 }
 0x19f   :  { %v241_v9 = vrot.slane %v240_v5, 1 }
 0x1a0   :  { %v250_v10 = vmax.f32 %v248_v3, %v249_v7 }
 0x1a1   :  { %v242_v11 = vmax.f32 %v240_v5, %v241_v9 }
 0x1a2   :  { %v254_v12 = vsub.f32 %v228_v51, %v250_v10  ;;  %v255_v13 = vsub.f32 %v231_v57, %v250_v10  ;;  %v256_v17 = vsub.f32 %v234_v54, %v250_v10 }
 0x1a3   :  { %v251_v14 = vsub.f32 %v219_v52, %v242_v11  ;;  %v252_v15 = vsub.f32 %v222_v53, %v242_v11  ;;  %v253_v16 = vsub.f32 %v225_v56, %v242_v11 }
 0x1a4   :  { %v263_v18 = vmul.f32 1.442695, %v254_v12  ;;  %v265_v22 = vmul.f32 1.442695, %v255_v13  ;;  %v267_v23 = vmul.f32 1.442695, %v256_v17 }
 0x1a5   :  { %v257_v19 = vmul.f32 1.442695, %v251_v14  ;;  %v259_v20 = vmul.f32 1.442695, %v252_v15  ;;  %v261_v21 = vmul.f32 1.442695, %v253_v16 }
 0x1a6   :  { %459 = vpow2.f32 %v263_v18 }
 0x1a7   :  { %461 = vpow2.f32 %v257_v19 }
 0x1a8   :  { %463 = vpow2.f32 %v259_v20 }
 0x1a9   :  { %465 = vpow2.f32 %v261_v21 }
 0x1aa   :  { %467 = vpow2.f32 %v265_v22 }
 0x1ab   :  { %469 = vpow2.f32 %v267_v23 }
 0x1ac   :  { %v460_v24 = vpop.eup %459 }
 0x1ad   :  { %v462_v25 = vpop.eup %461 }
 0x1ae   :  { %v464_v26 = vpop.eup %463 }
 0x1af   :  { %v466_v27 = vpop.eup %465  ;;  %v269_v28 = vadd.f32 %v464_v26, %v462_v25 }
 0x1b0   :  { %v468_v30 = vpop.eup %467 }
 0x1b1   :  { %v270_v36 = vadd.f32 %v466_v27, %v269_v28  ;;  %v277_v38 = vadd.f32 %v468_v30, %v460_v24  ;;  %v470_v39 = vpop.eup %469 }
 0x1b3   :  { %v271_v42 = vrot.slane %v270_v36, 4  ;;  %v278_v43 = vadd.f32 %v470_v39, %v277_v38 }
 0x1b5   :  { %v272_v44 = vadd.f32 %v271_v42, %v270_v36  ;;  %v279_v45 = vrot.slane %v278_v43, 4 }
 0x1b7   :  { %v273_v46 = vrot.slane %v272_v44, 2  ;;  %v280_v47 = vadd.f32 %v279_v45, %v278_v43 }
 0x1b9   :  { %v274_v48 = vadd.f32 %v273_v46, %v272_v44  ;;  %v281_v49 = vrot.slane %v280_v47, 2  ;;  %v369_v46 = vld [vmem:[%s666_s5 + $0x38] sm:$0xff] }
 0x1ba   :  { %386 = vmatpush.msra.mxu0 %v369_v46 }
 0x1bb   :  { %v275_v50 = vrot.slane %v274_v48, 1  ;;  %v282_v51 = vadd.f32 %v281_v49, %v280_v47  ;;  %v368_v47 = vld [vmem:[%s666_s5 + $0x30] sm:$0xff]  ;;  %v366_v49 = vld [vmem:[%s666_s5 + $0x20] sm:$0xff] }
 0x1bc   :  { %387 = vmatpush.msra.mxu0 %v368_v47 }
 0x1bd   :  { %v276_v52 = vadd.f32 %v275_v50, %v274_v48  ;;  %v283_v53 = vrot.slane %v282_v51, 1  ;;  %v367_v48 = vld [vmem:[%s666_s5 + $0x28] sm:$0xff]  ;;  %v365_v50 = vld [vmem:[%s666_s5 + $0x18] sm:$0xff] }
 0x1be   :  { %388 = vmatpush.msra.mxu0 %v367_v48 }
 0x1bf   :  { %471 = vrcp.f32 %v276_v52  ;;  %v284_v54 = vadd.f32 %v283_v53, %v282_v51  ;;  %v296_v59 = vand.u32 2147483648, %v276_v52  ;;  %v294_v62 = vand.u32 2147483647, %v276_v52  ;;  %v364_v51 = vld [vmem:[%s666_s5 + $0x10] sm:$0xff] }
 0x1c0   :  { %vm290_vm7 = vweird.f32 %v276_v52  ;;  %389 = vmatpush.msra.mxu0 %v366_v49 }
 0x1c1   :  { %473 = vrcp.f32 %v284_v54  ;;  %v313_v1 = vand.u32 2147483648, %v284_v54  ;;  %v297_v2 = vor.u32 1.1754944e-38, %v296_v59  ;;  %v311_v4 = vand.u32 2147483647, %v284_v54 }
 0x1c2   :  { %vm295_vm10 = vcmp.eq.f32.partialorder %v294_v62, 8.507059e+37  ;;  %vm307_vm11 = vweird.f32 %v284_v54  ;;  %390 = vmatpush.msra.mxu0 %v365_v50 }
 0x1c3   :  { %v314_v11 = vor.u32 1.1754944e-38, %v313_v1  ;;  %vm312_vm13 = vcmp.eq.f32.partialorder %v311_v4, 8.507059e+37 }
 0x1c4   :  { %391 = vmatpush.msra.mxu0 %v364_v51 }
 0x1c5   :  { %v472_v55 = vpop.eup %471 }
 0x1c6   :  { %v286_v56 = vmul.f32 %v472_v55, %v276_v52  ;;  %vm291_vm6 = vweird.f32 %v472_v55  ;;  %v159_v52 = vpop.permute.xlu0 %158 }
 0x1c7   :  { %v474_v57 = vpop.eup %473  ;;  %vm292_vm8 = vmor %vm290_vm7, %vm291_vm6  ;;  %v160_v53 = vperm.slane %v159_v52, 0 }
 0x1c8   :  { %v287_v58 = vsub.f32 1.0, %v286_v56  ;;  %v303_v60 = vmul.f32 %v474_v57, %v284_v54  ;;  %vm308_vm9 = vweird.f32 %v474_v57  ;;  %v161_v54 = vperm.slane %v159_v52, 1 }
 0x1c9   :  { %vm309_vm12 = vmor %vm307_vm11, %vm308_vm9  ;;  %475 = vrcp.f32 %v160_v53  ;;  %vm169_vm15 = vweird.f32 %v160_v53  ;;  %v175_v59 = vand.u32 2147483648, %v160_v53  ;;  %v173_v62 = vand.u32 2147483647, %v160_v53 }
 0x1ca   :  { %v288_v61 = vmul.f32 %v472_v55, %v287_v58  ;;  %v304_v63 = vsub.f32 1.0, %v303_v60  ;;  %477 = vrcp.f32 %v161_v54  ;;  %vm184_vm1 = vweird.f32 %v161_v54 }
 0x1cb   :  { %v188_v1 = vand.u32 2147483647, %v161_v54  ;;  %vm174_vm4 = vcmp.eq.f32.partialorder %v173_v62, 8.507059e+37  ;;  %vm398_vm9 = vcmask 17408  }
 0x1cc   :  { %v289_v0 = vadd.f32 %v472_v55, %v288_v61  ;;  %v305_v3 = vmul.f32 %v474_v57, %v304_v63  ;;  %v190_v63 = vand.u32 2147483648, %v161_v54 }
 0x1cd   :  { %vm189_vm7 = vcmp.eq.f32.partialorder %v188_v1, 8.507059e+37 }
 0x1ce   :  { %v293_v5 = vsel %vm292_vm8, %v472_v55, %v289_v0  ;;  %v306_v7 = vadd.f32 %v474_v57, %v305_v3  ;;  %v363_v55 = vld [vmem:[%s666_s5 + $0x8] sm:$0xff]  ;;  %v176_v3 = vor.u32 1.1754944e-38, %v175_v59  ;;  %vm374_vm8 = vcmask 523264  }
 0x1cf   :  { %v298_v6 = vsel %vm295_vm10, %v297_v2, %v293_v5  ;;  %392 = vmatpush.msra.mxu0 %v363_v55  ;;  %v476_v56 = vpop.eup %475 }
 0x1d0   :  { %v299_v8 = vmul.f32 %v462_v25, %v298_v6  ;;  %v300_v9 = vmul.f32 %v464_v26, %v298_v6  ;;  %v301_v10 = vmul.f32 %v466_v27, %v298_v6  ;;  %v310_v12 = vsel %vm309_vm12, %v474_v57, %v306_v7  ;;  %v478_v57 = vpop.eup %477  ;;  %v154_v7 = vld [vmem:[#allocation2] sm:$0x1] }
 0x1d1   :  { %v315_v16 = vsel %vm312_vm13, %v314_v11, %v310_v12  ;;  %v165_v58 = vmul.f32 %v476_v56, %v160_v53  ;;  %v180_v60 = vmul.f32 %v478_v57, %v161_v54  ;;  %vm170_vm0 = vweird.f32 %v476_v56 }
 0x1d2   :  { %v319_v13 = vmul.f32 %v437_v34, %v299_v8  ;;  %v320_v14 = vmul.f32 %v438_v35, %v300_v9  ;;  %v321_v15 = vmul.f32 %v441_v40, %v301_v10  ;;  %v316_v17 = vmul.f32 %v460_v24, %v315_v16  ;;  %vm171_vm3 = vmor %vm169_vm15, %vm170_vm0  ;;  %v155_v9 = vld [vmem:[#allocation2 + $0x1] sm:$0x1] }
 0x1d3   :  { %v317_v18 = vmul.f32 %v468_v30, %v315_v16  ;;  %v318_v19 = vmul.f32 %v470_v39, %v315_v16  ;;  %v166_v61 = vsub.f32 1.0, %v165_v58  ;;  %v181_v0 = vsub.f32 1.0, %v180_v60  ;;  %v362_v16 = vld [vmem:[%s666_s5] sm:$0xff] }
 0x1d4   :  { %v325_v20 = vsel %vm216_vm5, %v319_v13, 0.0  ;;  %v326_v21 = vsel %vm216_vm5, %v320_v14, 0.0  ;;  %v322_v22 = vmul.f32 %v442_v31, %v316_v17  ;;  %v328_v40 = vsel %vm216_vm5, %v321_v15, 0.0  ;;  %393 = vmatpush.msra.mxu0 %v362_v16 }
 0x1d5   :  { %v323_v34 = vmul.f32 %v445_v41, %v317_v18  ;;  %v324_v32 = vmul.f32 %v446_v37, %v318_v19  ;;  %v327_v35 = vadd.f32 %v326_v21, %v325_v20  ;;  %vm185_vm2 = vweird.f32 %v478_v57  ;;  %v458_v20 = vld [vmem:[%s667_s6] ss:$0 sm:$0xff] }
 0x1d6   :  { %v336_v23 = vsel %vm216_vm5, %v322_v22, 0.0  ;;  %v167_v2 = vmul.f32 %v476_v56, %v166_v61  ;;  %v182_v4 = vmul.f32 %v478_v57, %v181_v0  ;;  %vm186_vm6 = vmor %vm184_vm1, %vm185_vm2  ;;  %v191_v6 = vor.u32 1.1754944e-38, %v190_v63 }
 0x1d7   :  { %v337_v24 = vsel %vm216_vm5, %v323_v34, 0.0  ;;  %v329_v25 = vadd.f32 %v328_v40, %v327_v35  ;;  %v339_v28 = vsel %vm216_vm5, %v324_v32, 0.0 }
 0x1d8   :  { %v338_v26 = vadd.f32 %v337_v24, %v336_v23  ;;  %v168_v5 = vadd.f32 %v476_v56, %v167_v2  ;;  %v183_v8 = vadd.f32 %v478_v57, %v182_v4 }
 0x1d9   :  { %v330_v27 = vrot.slane %v329_v25, 4 }
 0x1da   :  { %v340_v29 = vadd.f32 %v339_v28, %v338_v26  ;;  %v172_v10 = vsel %vm171_vm3, %v476_v56, %v168_v5  ;;  %v187_v12 = vsel %vm186_vm6, %v478_v57, %v183_v8 }
 0x1db   :  { %v331_v31 = vadd.f32 %v330_v27, %v329_v25  ;;  %v177_v11 = vsel %vm174_vm4, %v176_v3, %v172_v10  ;;  %v192_v14 = vsel %vm189_vm7, %v191_v6, %v187_v12 }
 0x1dc   :  { %v341_v30 = vrot.slane %v340_v29, 4  ;;  %v178_v13 = vmul.f32 %v177_v11, %v154_v7  ;;  %v193_v15 = vmul.f32 %v192_v14, %v155_v9 }
 0x1dd   :  { %v332_v36 = vrot.slane %v331_v31, 2 }
 0x1de   :  { %v342_v41 = vadd.f32 %v341_v30, %v340_v29  ;;  %349 = vst [vmem:[#allocation1] ss:$9 sm:$0xff] %v178_v13 }
 0x1df   :  { %v333_v38 = vadd.f32 %v332_v36, %v331_v31  ;;  %351 = vst [vmem:[#allocation1 + $0x1] ss:$9 sm:$0xff] %v193_v15 }
 0x1e0   :  { %v343_v33 = vrot.slane %v342_v41, 2 }
 0x1e1   :  { %v334_v37 = vrot.slane %v333_v38, 1 }
 0x1e2   :  { %v344_v39 = vadd.f32 %v343_v33, %v342_v41 }
 0x1e3   :  { %v335_v42 = vadd.f32 %v334_v37, %v333_v38 }
 0x1e4   :  { %v345_v43 = vrot.slane %v344_v39, 1 }
 0x1e6   :  { %v346_v44 = vadd.f32 %v345_v43, %v344_v39  ;;  %v352_v18 = vld [vmem:[#allocation1] sm:$0xff] }
 0x1e8   :  { %v357_v45 = vsel %vm356_vm14, %v346_v44, %v335_v42 }
 0x1e9   :  { %358 = vrot.lane.b32.xlu1 %v357_v45, %s509_s1 }
 0x25b   :  { %v359_v17 = vpop.permute.xlu1 %358 }
 0x25c   :  { %v361_v19 = vsel %vm216_vm5, %v352_v18, %v359_v17 }
 0x25d   :  { %434 = vmatmul.msk.f32.vlgmr.msra.gmra.mxu0 %vm374_vm8, %v361_v19 }
 0x2da   :  { %v395_v21 = vpop.f32.mrf.mxu0 }
 0x2db   :  { %v396_v22 = vadd.f32 %v458_v20, %v395_v21 }
 0x2dd   :  { %399 = vst.msk [vmem:[#allocation5] sm:$0x3] %vm398_vm9, %v396_v22 }
 0x2de   :  { %410 = dma.vmem_to_hbm [thread:$0]  %s406_s12, 32, %s408_s15, [#allocation6]  }
 0x2df   :  { %503 = dma.done.wait [#allocation6], 32  }
 0x2e0   :  { %504 = vsyncadd [#allocation6], 4294967264 }
 0x2e1   :  { %415 = vsyncpa [#allocation6], 1 }

</bundles_post_ra>
